<compile_context>
chip_gen: v7x
topology: tpu7x:2x2x1
jax: 0.10.0
libtpu: 0.0.40
codegen_flags: <defaults>
</compile_context>

<pallas_src>
import functools

import numpy as np
import jax
import jax.numpy as jnp
from jax import lax
from jax.experimental import pallas as pl
from jax.experimental.pallas import tpu as pltpu


def _round_up(x, m):
    return ((x + m - 1) // m) * m


def _vmem_capacity_bytes():
    """Physical VMEM of the current TPU generation (conservative fallback)."""
    try:
        info = pltpu.get_tpu_info()
        cap = getattr(info, "vmem_capacity_bytes", None)
        if cap:
            return int(cap)
    except Exception:
        pass
    return 64 * 1024 * 1024  # v7x-sized fallback; safe everywhere.


def _fourier_cross_attn_kernel(q_ref, k_ref, wq_ref, wk_ref, wi_ref, out_ref, y_ref,
                               *, bg_sz, n_heads, e_dim, mq_pad, mkv_pad,
                               out_seq_lanes):
    f32 = jnp.float32
    bf16 = jnp.bfloat16
    # dot_general dimension numbers (single-transpose forms, MXU-native):
    dn_lhs_t = (((0,), (0,)), ((), ()))   # contract sublane dim of both: A^T @ B
    dn_rhs_t = (((1,), (1,)), ((), ()))   # contract lane dim of both:    A @ B^T

    # Constant DFT matrices, loaded once per program (hoisted out of the loops).
    wq = wq_ref[...]                      # (L, 2*mq_pad)  bf16  [cos | -sin]
    wk = wk_ref[...]                      # (S, 2*mkv_pad) bf16
    wi = wi_ref[...]                      # (L, 2*mq_pad)  bf16  (scaled inverse DFT)

    # BG and G are small (bounded by the VMEM budget), so static Python loops are
    # fine; all live ranges are bounded by the y_ref scratch writes.
    for bg in range(bg_sz):
        # --- truncated rDFT for all G heads at once: one wide bf16 matmul each ---
        # q_ref[bg]: (G*E, L) bf16 -> xq = [Re | 0pad | Im | 0pad]  (G*E, 2*mq_pad) f32
        xq = jnp.dot(q_ref[bg], wq, preferred_element_type=f32)
        xk = jnp.dot(k_ref[bg], wk, preferred_element_type=f32)

        # --- per-head complex cross attention ------------------------------------
        for g in range(n_heads):
            lo = g * e_dim
            # Slice in f32 (8-sublane aligned for E % 8 == 0), then cast the small
            # per-head operands to bf16 for the MXU.
            xq_h = xq[lo:lo + e_dim, :].astype(bf16)   # (E, 2*mq_pad)
            xk_h = xk[lo:lo + e_dim, :].astype(bf16)   # (E, 2*mkv_pad)

            # P[u, v] = sum_e xq_h[e, u] * xk_h[e, v]   -> (2*mq_pad, 2*mkv_pad) f32
            p = lax.dot_general(xq_h, xk_h, dn_lhs_t, preferred_element_type=f32)
            # Complex product Xq^T Xk (no conjugation); tanh on re/im parts.
            # All slice boundaries are sublane(8)/lane(128)-aligned; tanh(0)=0 keeps
            # the zero padding exact.
            a_r = jnp.tanh(p[:mq_pad, :mkv_pad] - p[mq_pad:, mkv_pad:])
            a_i = jnp.tanh(p[:mq_pad, mkv_pad:] + p[mq_pad:, :mkv_pad])

            # R = [[a_r, -a_i], [a_i, a_r]]  so that  [Xk_r|Xk_i] @ R^T = [Y_r | Y_i]
            r = jnp.concatenate(
                [jnp.concatenate([a_r, -a_i], axis=1),
                 jnp.concatenate([a_i, a_r], axis=1)], axis=0).astype(bf16)

            # Y[e, u] = sum_v xk_h[e, v] * R[u, v]   -> (E, 2*mq_pad), f32 accumulate,
            # written straight into the VMEM scratch (bounds live ranges).
            y_ref[lo:lo + e_dim, :] = lax.dot_general(
                xk_h, r, dn_rhs_t, preferred_element_type=f32)

        # --- truncated irFFT for the whole head group in one matmul ---------------
        y_all = y_ref[...].astype(bf16)                 # (G*E, 2*mq_pad)
        if out_seq_lanes:
            # lane dim = L  -> out block row is (G*E, L)
            out_ref[bg] = lax.dot_general(y_all, wi, dn_rhs_t,
                                          preferred_element_type=f32)
        else:
            # lane dim = H*E -> out block row is (L, G*E)
            out_ref[bg] = lax.dot_general(wi, y_all, dn_rhs_t,
                                          preferred_element_type=f32)


def _choose_groups(B, H, E, L, S, mq_pad, mkv_pad, out_seq_lanes, budget_bytes):
    """Pick (batch-group BG, head-group G) under the VMEM budget.

    Keeps >= 2 grid programs whenever possible so dual-TensorCore chips (v7x)
    have both cores fed; blocks smaller than the full extents must satisfy the
    TPU tiling constraints (bf16 inputs: G*E % 16; lane=H*E output: G*E % 128).
    """
    def valid(G):
        if H % G:
            return False
        if G == H:
            return True
        ge = G * E
        if ge % 16:                      # bf16 input blocks: sublane packing granule
            return False
        if (not out_seq_lanes) and ge % 128:   # output lane dim = G*E in this layout
            return False
        return True

    def vmem_bytes(BG, G):
        ge = G * E
        mq2, mkv2 = 2 * mq_pad, 2 * mkv_pad
        b = 2 * 2 * BG * ge * (L + S)            # q/k bf16 blocks, double-buffered
        b += 2 * 4 * BG * L * ge                 # f32 output block, double-buffered
        b += 2 * 2 * (2 * L * mq2 + S * mkv2)    # wq/wi/wk bf16 constants, x2 buffers
        b += 4 * ge * mq2                        # y scratch (f32)
        b += 4 * ge * (mq2 + mkv2)               # xq/xk intermediates (f32)
        b += 4 * 3 * mq2 * mkv2                  # p / r / a_r+a_i live set (f32)
        b += 2 * 1024 * 1024                     # compiler temporaries slack
        return b

    gs = [g for g in range(H, 0, -1) if valid(g) and vmem_bytes(1, g) <= budget_bytes]
    if not gs:
        gs = [g for g in range(1, H + 1) if valid(g)] or [H]
    # Prefer the largest head group that still leaves >= 2 grid programs.
    G = next((g for g in gs if B * (H // g) >= 2), gs[0])

    # Batch grouping: fewer, fatter grid steps (amortizes the ~0.35us/step overhead
    # and the constant wq/wk/wi buffers) while keeping >= 2 programs when possible.
    min_progs = 2 if B * (H // G) >= 2 else 1
    BG = 1
    for cand in range(B, 0, -1):
        if B % cand == 0 and (B // cand) * (H // G) >= min_progs \
                and vmem_bytes(cand, G) <= budget_bytes:
            BG = cand
            break
    return BG, G


def fourier_cross_attention_w(q, k, v, in_channels, out_channels,
                              modes=16, activation='tanh'):
    """q: [B, L, E, H], k/v: [B, S, E, H]. Returns ([B, L, H, E], None)."""
    if activation != 'tanh':
        # TODO(synk): 'softmax' activation branch (abs -> softmax over last axis) not implemented.
        raise NotImplementedError("only the default 'tanh' activation is implemented")
    del v  # v is unused by the reference forward pass

    B, L, E, H = q.shape
    S = k.shape[1]
    mq = min(L // 2, modes)
    mkv = min(S // 2, modes)
    # Re|Im packing padded so that every in-kernel split/concat is tile-aligned:
    # mq lands on p's sublane axis (8-granule), mkv on p's lane axis (128-granule).
    mq_pad = _round_up(mq, 8)
    mkv_pad = _round_up(mkv, 128)
    if E % 8:
        # Per-head sublane slices would be unaligned (correct but slow).
        # TODO(synk): pad E up to a multiple of 8 for odd embed-per-head configs.
        pass

    # Output orientation: keep lanes on the wider of (H*E) and L; flipping to
    # (B, H*E, L) avoids sub-128-lane masked stores when H*E < 128.
    out_seq_lanes = (H * E < 128) and (L >= H * E)

    vmem_cap = _vmem_capacity_bytes()
    budget = int(vmem_cap * 0.4)               # ~25 MiB on v7x, ~51 MiB on v5e/v6e
    BG, G = _choose_groups(B, H, E, L, S, mq_pad, mkv_pad, out_seq_lanes, budget)
    GE = G * E

    # Single fused XLA transpose + bf16 downcast per input: (B,L,E,H) -> (B,H*E,L).
    # TODO(synk): q/k input permutes are still full-tensor HBM copies; consuming the
    # native (B, L, E, H) layout in-kernel would need tiny lane-strided per-head DMAs.
    xq = jnp.transpose(q, (0, 3, 2, 1)).reshape(B, H * E, L).astype(jnp.bfloat16)
    xk = jnp.transpose(k, (0, 3, 2, 1)).reshape(B, H * E, S).astype(jnp.bfloat16)

    # ---- packed, zero-padded DFT / inverse-DFT matrices (built once, float64) ----
    # Forward rDFT, packed along lanes: Wq = [cos | 0 | -sin | 0]   (L, 2*mq_pad)
    ang_q = 2.0 * np.pi * np.outer(np.arange(L), np.arange(mq)) / L
    wq = np.zeros((L, 2 * mq_pad))
    wq[:, :mq] = np.cos(ang_q)
    wq[:, mq_pad:mq_pad + mq] = -np.sin(ang_q)

    ang_k = 2.0 * np.pi * np.outer(np.arange(S), np.arange(mkv)) / S
    wk = np.zeros((S, 2 * mkv_pad))
    wk[:, :mkv] = np.cos(ang_k)
    wk[:, mkv_pad:mkv_pad + mkv] = -np.sin(ang_k)

    # Truncated irFFT of Y/(Cin*Cout) with n=L, packed as (L, 2*mq_pad):
    #   out[l] = scale * sum_m w_m * (Re Y_m cos(2 pi m l/L) - Im Y_m sin(2 pi m l/L))
    # (m=0 sin column is identically zero -> the DC imaginary part is dropped, as torch does.)
    scale = 1.0 / (in_channels * out_channels * L)
    wgt = np.where(np.arange(mq) == 0, 1.0, 2.0)[None, :]
    ang_i = 2.0 * np.pi * np.outer(np.arange(L), np.arange(mq)) / L
    wi = np.zeros((L, 2 * mq_pad))
    wi[:, :mq] = scale * wgt * np.cos(ang_i)
    wi[:, mq_pad:mq_pad + mq] = -scale * wgt * np.sin(ang_i)

    kernel = functools.partial(_fourier_cross_attn_kernel, bg_sz=BG, n_heads=G,
                               e_dim=E, mq_pad=mq_pad, mkv_pad=mkv_pad,
                               out_seq_lanes=out_seq_lanes)

    if out_seq_lanes:
        out_shape = jax.ShapeDtypeStruct((B, H * E, L), jnp.float32)
        out_spec = pl.BlockSpec((BG, GE, L), lambda b, hg: (b, hg, 0))
    else:
        out_shape = jax.ShapeDtypeStruct((B, L, H * E), jnp.float32)
        out_spec = pl.BlockSpec((BG, L, GE), lambda b, hg: (b, 0, hg))

    out_flat = pl.pallas_call(
        kernel,
        out_shape=out_shape,
        grid=(B // BG, H // G),
        in_specs=[
            pl.BlockSpec((BG, GE, L), lambda b, hg: (b, hg, 0)),
            pl.BlockSpec((BG, GE, S), lambda b, hg: (b, hg, 0)),
            pl.BlockSpec((L, 2 * mq_pad), lambda b, hg: (0, 0)),
            pl.BlockSpec((S, 2 * mkv_pad), lambda b, hg: (0, 0)),
            pl.BlockSpec((L, 2 * mq_pad), lambda b, hg: (0, 0)),
        ],
        out_specs=out_spec,
        scratch_shapes=[pltpu.VMEM((GE, 2 * mq_pad), jnp.float32)],
        compiler_params=pltpu.CompilerParams(
            dimension_semantics=("parallel", "parallel"),
            vmem_limit_bytes=min(int(vmem_cap * 0.75), 100 * 1024 * 1024)),
    )(xq, xk,
      jnp.asarray(wq, jnp.bfloat16),
      jnp.asarray(wk, jnp.bfloat16),
      jnp.asarray(wi, jnp.bfloat16))

    if out_seq_lanes:
        # (B, H*E, L) -> (B, L, H, E): cheap post-permute of a small f32 tensor.
        out = jnp.transpose(out_flat.reshape(B, H, E, L), (0, 3, 1, 2))
    else:
        # (B, L, H*E) -> (B, L, H, E): free reshape.
        out = out_flat.reshape(B, L, H, E)
    return out, None


def _reference_numpy(q, k, in_channels, out_channels, modes):
    """Pure numpy re-implementation of the PyTorch forward (tanh activation)."""
    B, L, E, H = q.shape
    S = k.shape[1]
    Mq = min(L // 2, modes)
    Mkv = min(S // 2, modes)
    xq = np.transpose(q, (0, 3, 2, 1)).astype(np.float64)
    xk = np.transpose(k, (0, 3, 2, 1)).astype(np.float64)
    xq_ft = np.fft.rfft(xq, axis=-1)[..., :Mq]
    xk_ft = np.fft.rfft(xk, axis=-1)[..., :Mkv]
    xqk = np.einsum('bhex,bhey->bhxy', xq_ft, xk_ft)
    xqk = np.tanh(xqk.real) + 1j * np.tanh(xqk.imag)
    xqkv = np.einsum('bhxy,bhey->bhex', xqk, xk_ft)
    out_ft = np.zeros((B, H, E, L // 2 + 1), dtype=np.complex128)
    out_ft[..., :Mq] = xqkv
    out_ft[..., 0] = out_ft[..., 0].real   # irfft ignores the imaginary DC part
    out = np.fft.irfft(out_ft / (in_channels * out_channels), n=L, axis=-1)
    return np.transpose(out, (0, 3, 1, 2))


if __name__ == "__main__":
    def _run_case(B, L, S, E, H, in_channels, out_channels, modes, key):
        kq, kk, kv = jax.random.split(key, 3)
        q = jax.random.normal(kq, (B, L, E, H), dtype=jnp.float32)
        k = jax.random.normal(kk, (B, S, E, H), dtype=jnp.float32)
        v = jax.random.normal(kv, (B, S, E, H), dtype=jnp.float32)
        out, _ = fourier_cross_attention_w(q, k, v, in_channels, out_channels, modes)
        out = jax.block_until_ready(out)
        ref = _reference_numpy(np.asarray(q), np.asarray(k),
                               in_channels, out_channels, modes)
        # bf16 matmul operands (f32 accumulation) -> relaxed tolerance vs f64 reference.
        np.testing.assert_allclose(np.asarray(out), ref, rtol=2e-2, atol=2e-2)

    root = jax.random.PRNGKey(0)
    k0, k1, k2 = jax.random.split(root, 3)
    # Base config (lane = H*E output orientation).
    _run_case(B=2, L=16, S=16, E=8, H=4, in_channels=8, out_channels=8, modes=16, key=k0)
    # L != S, Mq != Mkv, flipped (lane = L) output orientation.
    _run_case(B=2, L=32, S=24, E=8, H=4, in_channels=8, out_channels=8, modes=16, key=k1)
    # Batch-grouped grid path (BG > 1) with few heads.
    _run_case(B=4, L=16, S=16, E=8, H=2, in_channels=8, out_channels=8, modes=16, key=k2)
    print("KERNEL_OK")
</pallas_src>

<mosaic_0001>
module attributes {stable_mosaic.version = 11 : i64} {
  func.func @_fourier_cross_attn_kernel(%arg0: i32, %arg1: i32, %arg2: memref<1x32x16xbf16, #tpu.memory_space<vmem>>, %arg3: memref<1x32x16xbf16, #tpu.memory_space<vmem>>, %arg4: memref<16x16xbf16, #tpu.memory_space<vmem>>, %arg5: memref<16x256xbf16, #tpu.memory_space<vmem>>, %arg6: memref<16x16xbf16, #tpu.memory_space<vmem>>, %arg7: memref<1x16x32xf32, #tpu.memory_space<vmem>>, %arg8: memref<32x16xf32, #tpu.memory_space<vmem>>) attributes {dimension_semantics = [#tpu.dimension_semantics<parallel>, #tpu.dimension_semantics<parallel>], iteration_bounds = array<i64: 2, 1>, scalar_prefetch = 0 : i64, scratch_operands = 1 : i64, tpu.core_type = #tpu.core_type<tc>, window_params = [{transform_indices = @transform_0, window_bounds = array<i64: 1, 32, 16>}, {transform_indices = @transform_1, window_bounds = array<i64: 1, 32, 16>}, {pipeline_mode = #tpu.pipeline_mode<synchronous>, transform_indices = @transform_2, window_bounds = array<i64: 16, 16>}, {pipeline_mode = #tpu.pipeline_mode<synchronous>, transform_indices = @transform_3, window_bounds = array<i64: 16, 256>}, {pipeline_mode = #tpu.pipeline_mode<synchronous>, transform_indices = @transform_4, window_bounds = array<i64: 16, 16>}, {transform_indices = @transform_5, window_bounds = array<i64: 1, 16, 32>}]} {
    %c0 = arith.constant 0 : index
    %c0_0 = arith.constant 0 : index
    %0 = vector.load %arg4[%c0, %c0_0] : memref<16x16xbf16, #tpu.memory_space<vmem>>, vector<16x16xbf16>
    %c0_1 = arith.constant 0 : index
    %c0_2 = arith.constant 0 : index
    %1 = vector.load %arg5[%c0_1, %c0_2] : memref<16x256xbf16, #tpu.memory_space<vmem>>, vector<16x256xbf16>
    %c0_3 = arith.constant 0 : index
    %c0_4 = arith.constant 0 : index
    %2 = vector.load %arg6[%c0_3, %c0_4] : memref<16x16xbf16, #tpu.memory_space<vmem>>, vector<16x16xbf16>
    %c0_5 = arith.constant 0 : index
    %c0_6 = arith.constant 0 : index
    %c0_7 = arith.constant 0 : index
    %3 = vector.load %arg2[%c0_5, %c0_6, %c0_7] : memref<1x32x16xbf16, #tpu.memory_space<vmem>>, vector<1x32x16xbf16>
    %4 = vector.shape_cast %3 : vector<1x32x16xbf16> to vector<32x16xbf16>
    %cst = arith.constant dense<0.000000e+00> : vector<32x16xf32>
    %5 = tpu.matmul %4, %0, %cst {dimension_numbers = #tpu.dot_dimension_numbers<[1], [0], [0], [1], [0, 0, 1, 1], [], []>} : vector<32x16xbf16>, vector<16x16xbf16>, vector<32x16xf32> -> vector<32x16xf32>
    %c0_8 = arith.constant 0 : index
    %c0_9 = arith.constant 0 : index
    %c0_10 = arith.constant 0 : index
    %6 = vector.load %arg3[%c0_8, %c0_9, %c0_10] : memref<1x32x16xbf16, #tpu.memory_space<vmem>>, vector<1x32x16xbf16>
    %7 = vector.shape_cast %6 : vector<1x32x16xbf16> to vector<32x16xbf16>
    %cst_11 = arith.constant dense<0.000000e+00> : vector<32x256xf32>
    %8 = tpu.matmul %7, %1, %cst_11 {dimension_numbers = #tpu.dot_dimension_numbers<[1], [0], [0], [1], [0, 0, 1, 1], [], []>} : vector<32x16xbf16>, vector<16x256xbf16>, vector<32x256xf32> -> vector<32x256xf32>
    %9 = vector.extract_strided_slice %5 {offsets = [0, 0], sizes = [8, 16], strides = [1, 1]} : vector<32x16xf32> to vector<8x16xf32>
    %10 = arith.truncf %9 : vector<8x16xf32> to vector<8x16xbf16>
    %11 = vector.extract_strided_slice %8 {offsets = [0, 0], sizes = [8, 256], strides = [1, 1]} : vector<32x256xf32> to vector<8x256xf32>
    %12 = arith.truncf %11 : vector<8x256xf32> to vector<8x256xbf16>
    %cst_12 = arith.constant dense<0.000000e+00> : vector<16x256xf32>
    %13 = tpu.matmul %10, %12, %cst_12 {dimension_numbers = #tpu.dot_dimension_numbers<[0], [0], [1], [1], [0, 1, 1, 1], [], []>} : vector<8x16xbf16>, vector<8x256xbf16>, vector<16x256xf32> -> vector<16x256xf32>
    %14 = vector.extract_strided_slice %13 {offsets = [0, 0], sizes = [8, 128], strides = [1, 1]} : vector<16x256xf32> to vector<8x128xf32>
    %15 = vector.extract_strided_slice %13 {offsets = [8, 128], sizes = [8, 128], strides = [1, 1]} : vector<16x256xf32> to vector<8x128xf32>
    %16 = arith.subf %14, %15 : vector<8x128xf32>
    %17 = math.tanh %16 : vector<8x128xf32>
    %18 = vector.extract_strided_slice %13 {offsets = [0, 128], sizes = [8, 128], strides = [1, 1]} : vector<16x256xf32> to vector<8x128xf32>
    %19 = vector.extract_strided_slice %13 {offsets = [8, 0], sizes = [8, 128], strides = [1, 1]} : vector<16x256xf32> to vector<8x128xf32>
    %20 = arith.addf %18, %19 : vector<8x128xf32>
    %21 = math.tanh %20 : vector<8x128xf32>
    %cst_13 = arith.constant 0.000000e+00 : f32
    %22 = vector.broadcast %cst_13 : f32 to vector<8x128xf32>
    %23 = arith.subf %22, %21 : vector<8x128xf32>
    %24 = tpu.concatenate %17, %23 in 1 : vector<8x128xf32>, vector<8x128xf32> -> vector<8x256xf32>
    %25 = tpu.concatenate %21, %17 in 1 : vector<8x128xf32>, vector<8x128xf32> -> vector<8x256xf32>
    %26 = tpu.concatenate %24, %25 in 0 : vector<8x256xf32>, vector<8x256xf32> -> vector<16x256xf32>
    %27 = arith.truncf %26 : vector<16x256xf32> to vector<16x256xbf16>
    %cst_14 = arith.constant dense<0.000000e+00> : vector<8x16xf32>
    %28 = tpu.matmul %12, %27, %cst_14 {dimension_numbers = #tpu.dot_dimension_numbers<[1], [1], [0], [0], [0, 0, 1, 0], [], []>} : vector<8x256xbf16>, vector<16x256xbf16>, vector<8x16xf32> -> vector<8x16xf32>
    %c0_15 = arith.constant 0 : index
    %c0_16 = arith.constant 0 : index
    %29 = vector.load %arg8[%c0_15, %c0_16] : memref<32x16xf32, #tpu.memory_space<vmem>>, vector<8x16xf32>
    tpu.vector_store %arg8[%c0_15, %c0_16], %28 {strides = array<i32>} : memref<32x16xf32, #tpu.memory_space<vmem>>, vector<8x16xf32>,
    %30 = vector.extract_strided_slice %5 {offsets = [8, 0], sizes = [8, 16], strides = [1, 1]} : vector<32x16xf32> to vector<8x16xf32>
    %31 = arith.truncf %30 : vector<8x16xf32> to vector<8x16xbf16>
    %32 = vector.extract_strided_slice %8 {offsets = [8, 0], sizes = [8, 256], strides = [1, 1]} : vector<32x256xf32> to vector<8x256xf32>
    %33 = arith.truncf %32 : vector<8x256xf32> to vector<8x256xbf16>
    %cst_17 = arith.constant dense<0.000000e+00> : vector<16x256xf32>
    %34 = tpu.matmul %31, %33, %cst_17 {dimension_numbers = #tpu.dot_dimension_numbers<[0], [0], [1], [1], [0, 1, 1, 1], [], []>} : vector<8x16xbf16>, vector<8x256xbf16>, vector<16x256xf32> -> vector<16x256xf32>
    %35 = vector.extract_strided_slice %34 {offsets = [0, 0], sizes = [8, 128], strides = [1, 1]} : vector<16x256xf32> to vector<8x128xf32>
    %36 = vector.extract_strided_slice %34 {offsets = [8, 128], sizes = [8, 128], strides = [1, 1]} : vector<16x256xf32> to vector<8x128xf32>
    %37 = arith.subf %35, %36 : vector<8x128xf32>
    %38 = math.tanh %37 : vector<8x128xf32>
    %39 = vector.extract_strided_slice %34 {offsets = [0, 128], sizes = [8, 128], strides = [1, 1]} : vector<16x256xf32> to vector<8x128xf32>
    %40 = vector.extract_strided_slice %34 {offsets = [8, 0], sizes = [8, 128], strides = [1, 1]} : vector<16x256xf32> to vector<8x128xf32>
    %41 = arith.addf %39, %40 : vector<8x128xf32>
    %42 = math.tanh %41 : vector<8x128xf32>
    %cst_18 = arith.constant 0.000000e+00 : f32
    %43 = vector.broadcast %cst_18 : f32 to vector<8x128xf32>
    %44 = arith.subf %43, %42 : vector<8x128xf32>
    %45 = tpu.concatenate %38, %44 in 1 : vector<8x128xf32>, vector<8x128xf32> -> vector<8x256xf32>
    %46 = tpu.concatenate %42, %38 in 1 : vector<8x128xf32>, vector<8x128xf32> -> vector<8x256xf32>
    %47 = tpu.concatenate %45, %46 in 0 : vector<8x256xf32>, vector<8x256xf32> -> vector<16x256xf32>
    %48 = arith.truncf %47 : vector<16x256xf32> to vector<16x256xbf16>
    %cst_19 = arith.constant dense<0.000000e+00> : vector<8x16xf32>
    %49 = tpu.matmul %33, %48, %cst_19 {dimension_numbers = #tpu.dot_dimension_numbers<[1], [1], [0], [0], [0, 0, 1, 0], [], []>} : vector<8x256xbf16>, vector<16x256xbf16>, vector<8x16xf32> -> vector<8x16xf32>
    %c8 = arith.constant 8 : index
    %c0_20 = arith.constant 0 : index
    %50 = vector.load %arg8[%c8, %c0_20] : memref<32x16xf32, #tpu.memory_space<vmem>>, vector<8x16xf32>
    tpu.vector_store %arg8[%c8, %c0_20], %49 {strides = array<i32>} : memref<32x16xf32, #tpu.memory_space<vmem>>, vector<8x16xf32>,
    %51 = vector.extract_strided_slice %5 {offsets = [16, 0], sizes = [8, 16], strides = [1, 1]} : vector<32x16xf32> to vector<8x16xf32>
    %52 = arith.truncf %51 : vector<8x16xf32> to vector<8x16xbf16>
    %53 = vector.extract_strided_slice %8 {offsets = [16, 0], sizes = [8, 256], strides = [1, 1]} : vector<32x256xf32> to vector<8x256xf32>
    %54 = arith.truncf %53 : vector<8x256xf32> to vector<8x256xbf16>
    %cst_21 = arith.constant dense<0.000000e+00> : vector<16x256xf32>
    %55 = tpu.matmul %52, %54, %cst_21 {dimension_numbers = #tpu.dot_dimension_numbers<[0], [0], [1], [1], [0, 1, 1, 1], [], []>} : vector<8x16xbf16>, vector<8x256xbf16>, vector<16x256xf32> -> vector<16x256xf32>
    %56 = vector.extract_strided_slice %55 {offsets = [0, 0], sizes = [8, 128], strides = [1, 1]} : vector<16x256xf32> to vector<8x128xf32>
    %57 = vector.extract_strided_slice %55 {offsets = [8, 128], sizes = [8, 128], strides = [1, 1]} : vector<16x256xf32> to vector<8x128xf32>
    %58 = arith.subf %56, %57 : vector<8x128xf32>
    %59 = math.tanh %58 : vector<8x128xf32>
    %60 = vector.extract_strided_slice %55 {offsets = [0, 128], sizes = [8, 128], strides = [1, 1]} : vector<16x256xf32> to vector<8x128xf32>
    %61 = vector.extract_strided_slice %55 {offsets = [8, 0], sizes = [8, 128], strides = [1, 1]} : vector<16x256xf32> to vector<8x128xf32>
    %62 = arith.addf %60, %61 : vector<8x128xf32>
    %63 = math.tanh %62 : vector<8x128xf32>
    %cst_22 = arith.constant 0.000000e+00 : f32
    %64 = vector.broadcast %cst_22 : f32 to vector<8x128xf32>
    %65 = arith.subf %64, %63 : vector<8x128xf32>
    %66 = tpu.concatenate %59, %65 in 1 : vector<8x128xf32>, vector<8x128xf32> -> vector<8x256xf32>
    %67 = tpu.concatenate %63, %59 in 1 : vector<8x128xf32>, vector<8x128xf32> -> vector<8x256xf32>
    %68 = tpu.concatenate %66, %67 in 0 : vector<8x256xf32>, vector<8x256xf32> -> vector<16x256xf32>
    %69 = arith.truncf %68 : vector<16x256xf32> to vector<16x256xbf16>
    %cst_23 = arith.constant dense<0.000000e+00> : vector<8x16xf32>
    %70 = tpu.matmul %54, %69, %cst_23 {dimension_numbers = #tpu.dot_dimension_numbers<[1], [1], [0], [0], [0, 0, 1, 0], [], []>} : vector<8x256xbf16>, vector<16x256xbf16>, vector<8x16xf32> -> vector<8x16xf32>
    %c16 = arith.constant 16 : index
    %c0_24 = arith.constant 0 : index
    %71 = vector.load %arg8[%c16, %c0_24] : memref<32x16xf32, #tpu.memory_space<vmem>>, vector<8x16xf32>
    tpu.vector_store %arg8[%c16, %c0_24], %70 {strides = array<i32>} : memref<32x16xf32, #tpu.memory_space<vmem>>, vector<8x16xf32>,
    %72 = vector.extract_strided_slice %5 {offsets = [24, 0], sizes = [8, 16], strides = [1, 1]} : vector<32x16xf32> to vector<8x16xf32>
    %73 = arith.truncf %72 : vector<8x16xf32> to vector<8x16xbf16>
    %74 = vector.extract_strided_slice %8 {offsets = [24, 0], sizes = [8, 256], strides = [1, 1]} : vector<32x256xf32> to vector<8x256xf32>
    %75 = arith.truncf %74 : vector<8x256xf32> to vector<8x256xbf16>
    %cst_25 = arith.constant dense<0.000000e+00> : vector<16x256xf32>
    %76 = tpu.matmul %73, %75, %cst_25 {dimension_numbers = #tpu.dot_dimension_numbers<[0], [0], [1], [1], [0, 1, 1, 1], [], []>} : vector<8x16xbf16>, vector<8x256xbf16>, vector<16x256xf32> -> vector<16x256xf32>
    %77 = vector.extract_strided_slice %76 {offsets = [0, 0], sizes = [8, 128], strides = [1, 1]} : vector<16x256xf32> to vector<8x128xf32>
    %78 = vector.extract_strided_slice %76 {offsets = [8, 128], sizes = [8, 128], strides = [1, 1]} : vector<16x256xf32> to vector<8x128xf32>
    %79 = arith.subf %77, %78 : vector<8x128xf32>
    %80 = math.tanh %79 : vector<8x128xf32>
    %81 = vector.extract_strided_slice %76 {offsets = [0, 128], sizes = [8, 128], strides = [1, 1]} : vector<16x256xf32> to vector<8x128xf32>
    %82 = vector.extract_strided_slice %76 {offsets = [8, 0], sizes = [8, 128], strides = [1, 1]} : vector<16x256xf32> to vector<8x128xf32>
    %83 = arith.addf %81, %82 : vector<8x128xf32>
    %84 = math.tanh %83 : vector<8x128xf32>
    %cst_26 = arith.constant 0.000000e+00 : f32
    %85 = vector.broadcast %cst_26 : f32 to vector<8x128xf32>
    %86 = arith.subf %85, %84 : vector<8x128xf32>
    %87 = tpu.concatenate %80, %86 in 1 : vector<8x128xf32>, vector<8x128xf32> -> vector<8x256xf32>
    %88 = tpu.concatenate %84, %80 in 1 : vector<8x128xf32>, vector<8x128xf32> -> vector<8x256xf32>
    %89 = tpu.concatenate %87, %88 in 0 : vector<8x256xf32>, vector<8x256xf32> -> vector<16x256xf32>
    %90 = arith.truncf %89 : vector<16x256xf32> to vector<16x256xbf16>
    %cst_27 = arith.constant dense<0.000000e+00> : vector<8x16xf32>
    %91 = tpu.matmul %75, %90, %cst_27 {dimension_numbers = #tpu.dot_dimension_numbers<[1], [1], [0], [0], [0, 0, 1, 0], [], []>} : vector<8x256xbf16>, vector<16x256xbf16>, vector<8x16xf32> -> vector<8x16xf32>
    %c24 = arith.constant 24 : index
    %c0_28 = arith.constant 0 : index
    %92 = vector.load %arg8[%c24, %c0_28] : memref<32x16xf32, #tpu.memory_space<vmem>>, vector<8x16xf32>
    tpu.vector_store %arg8[%c24, %c0_28], %91 {strides = array<i32>} : memref<32x16xf32, #tpu.memory_space<vmem>>, vector<8x16xf32>,
    %c0_29 = arith.constant 0 : index
    %c0_30 = arith.constant 0 : index
    %93 = vector.load %arg8[%c0_29, %c0_30] : memref<32x16xf32, #tpu.memory_space<vmem>>, vector<32x16xf32>
    %94 = arith.truncf %93 : vector<32x16xf32> to vector<32x16xbf16>
    %cst_31 = arith.constant dense<0.000000e+00> : vector<16x32xf32>
    %95 = tpu.matmul %2, %94, %cst_31 {dimension_numbers = #tpu.dot_dimension_numbers<[1], [1], [0], [0], [0, 0, 1, 0], [], []>} : vector<16x16xbf16>, vector<32x16xbf16>, vector<16x32xf32> -> vector<16x32xf32>
    %c0_32 = arith.constant 0 : index
    %c0_33 = arith.constant 0 : index
    %c0_34 = arith.constant 0 : index
    %96 = vector.load %arg7[%c0_32, %c0_33, %c0_34] : memref<1x16x32xf32, #tpu.memory_space<vmem>>, vector<1x16x32xf32>
    %97 = vector.shape_cast %96 : vector<1x16x32xf32> to vector<16x32xf32>
    %98 = vector.shape_cast %95 : vector<16x32xf32> to vector<1x16x32xf32>
    tpu.vector_store %arg7[%c0_32, %c0_33, %c0_34], %98 {strides = array<i32>} : memref<1x16x32xf32, #tpu.memory_space<vmem>>, vector<1x16x32xf32>,
    return
  }
  func.func @transform_0(%arg0: i32, %arg1: i32) -> (i32, i32, i32) {
    %c0_i32 = arith.constant 0 : i32
    %c0_i32_0 = arith.constant 0 : i32
    return %arg0, %arg1, %c0_i32 : i32, i32, i32
  }
  func.func @transform_1(%arg0: i32, %arg1: i32) -> (i32, i32, i32) {
    %c0_i32 = arith.constant 0 : i32
    %c0_i32_0 = arith.constant 0 : i32
    return %arg0, %arg1, %c0_i32 : i32, i32, i32
  }
  func.func @transform_2(%arg0: i32, %arg1: i32) -> (i32, i32) {
    %c0_i32 = arith.constant 0 : i32
    %c0_i32_0 = arith.constant 0 : i32
    %c0_i32_1 = arith.constant 0 : i32
    return %c0_i32, %c0_i32_0 : i32, i32
  }
  func.func @transform_3(%arg0: i32, %arg1: i32) -> (i32, i32) {
    %c0_i32 = arith.constant 0 : i32
    %c0_i32_0 = arith.constant 0 : i32
    %c0_i32_1 = arith.constant 0 : i32
    return %c0_i32, %c0_i32_0 : i32, i32
  }
  func.func @transform_4(%arg0: i32, %arg1: i32) -> (i32, i32) {
    %c0_i32 = arith.constant 0 : i32
    %c0_i32_0 = arith.constant 0 : i32
    %c0_i32_1 = arith.constant 0 : i32
    return %c0_i32, %c0_i32_0 : i32, i32
  }
  func.func @transform_5(%arg0: i32, %arg1: i32) -> (i32, i32, i32) {
    %c0_i32 = arith.constant 0 : i32
    %c0_i32_0 = arith.constant 0 : i32
    return %arg0, %c0_i32, %arg1 : i32, i32, i32
  }
}

</mosaic_0001>

<bundles_post_ra>
// kernel: tpu_custom_call.1
= control target key start
LH: loop header
LB: loop body
LE: loop exit
PB: predicated region body
PF: predicated region fallthrough
CT: control target
= control target key end

     0   :  { %10 = vsyncpa [#allocation4], 0  ;;  %s1555_s0 = inlined_call_operand.vmem [shape: bf16[2,32,16], index: 0, kind: input, shape index: {}]   ;;  %s1556_s1 = inlined_call_operand.vmem [shape: bf16[2,32,16], index: 1, kind: input, shape index: {}]   ;;  %s1557_s2 = inlined_call_operand.vmem [shape: bf16[16,16], index: 2, kind: input, shape index: {}]   ;;  %s1558_s3 = inlined_call_operand.vmem [shape: bf16[16,256], index: 3, kind: input, shape index: {}]   ;;  %s1559_s4 = inlined_call_operand.vmem [shape: bf16[16,16], index: 4, kind: input, shape index: {}]   ;;  %s1560_s5 = inlined_call_operand.hbm [shape: f32[2,16,32], index: 5, kind: output, shape index: {}]  }
   0x1   :  { %12 = vsyncpa [#allocation4 + $0x1], 0  ;;  %s1368_s18 = smov 0   ;;  %s1370_s19 = smov 0  }
   0x2   :  { %s1372_s20 = smov 0   ;;  %s1374_s21 = smov 0  }
   0x3   :  { %s1376_s22 = smov 0   ;;  %s1378_s23 = smov 0  }
   0x4 LB: > { %s1108_s24 = sadd.s32 4294967295, %s1330_s23   ;;  %s1109_s25 = sadd.s32 4294967294, %s1330_s23   ;;  %s1330_s23 = sphi %s1378_s23, %s18_s23   ;;  %s1326_s22 = sphi %s1376_s22, %s1567_s22   ;;  %s1322_s21 = sphi %s1374_s21, %s1566_s21   ;;  %s1318_s20 = sphi %s1372_s20, %s1565_s20   ;;  %s1314_s19 = sphi %s1370_s19, %s1564_s19   ;;  %s1310_s18 = sphi %s1368_s18, %s1563_s18  }
   0x5   : > { %s30_s26 = sadd.s32 1, %s1326_s22  ;;  %s158_s27 = sadd.s32 1, %s1318_s20 }
   0x6   : > { %p32_p0 = scmp.ge.s32.totalorder %s30_s26, 2  ;;  %p168_p1 = scmp.ne.s32.totalorder %s1318_s20, %s1314_s19 }
   0x7   : > { %p169_p2 = scmp.eq.s32.totalorder %s1108_s24, 1  ;;  %p174_p3 = scmp.ne.s32.totalorder %s1314_s19, %s1310_s18 }
   0x8   : > { %s1569_s26 = smov (%p32_p0, %s30_s26), 0  ;;  %p175_p5 = scmp.eq.s32.totalorder %s1109_s25, 1 }
   0x9   : > { %p1408_p4 = por %p169_p2, %p168_p1  ;;  %s153_s29 = ssub.s32 %s1326_s22, %s1569_s26 }
   0xa   : > { %p1112_p6 = scmp.ge.s32.totalorder %s1330_s23, 1  ;;  %p156_p7 = scmp.eq.s32.totalorder %s153_s29, 0 }
   0xb   : > { %p1415_p8 = por %p175_p5, %p174_p3  ;;  %p228_p9 = scmp.lt.s32.totalorder %s1330_s23, 3 }
   0xc   : > { %s1421_s6 = scalar_select %p156_p7, %s1318_s20, %s158_s27  }
   0xd   : > { %p229_p10 = pnand %p1112_p6, %p228_p9 }
   0xe   : > { %v1227_v0 = vld [vmem:[%s1557_s2] sm:$0xff] (!%p229_p10)   ;;  %p270_p11 = scmp.lt.s32.totalorder (!%p229_p10), %s1322_s21, 1  ;;  %v1332_v3 = vmov (!%p229_p10), 0   ;;  %vm316_vm0 = vcmask (!%p229_p10), 130048   ;;  %vm478_vm1 = vcmask (!%p229_p10), 1043456   ;;  %vm474_vm2 = vcmask (!%p229_p10), 64512  }
   0xf   : > { %232 = sbr.rel (%p229_p10) target bundleno = 1068 (0x42c), region = 40  ;;  %v1230_v1 = vld [vmem:[%s1558_s3 + $0x4] ss:$8 sps:$4 sm:$0xff] (!%p229_p10)   ;;  %1153 = vmatprep.subr.bf16.mxu0 (!%p229_p10), %v1227_v0  ;;  %v1232_v2 = vld [vmem:[%s1558_s3] ss:$8 sps:$4 sm:$0xff] (!%p229_p10)   ;;  %434 = vmatprep.mubr.bf16.mxu1 (!%p229_p10), %v1332_v3  ;;  %vm1334_vm3 = vmmov (!%p229_p10), 0  }
  0x10   : > { %1154 = vmatpush3.bf16.msra.mxu0 (!%p229_p10), %v1227_v0  ;;  %402 = vmatprep.subr.bf16.mxu1 (!%p229_p10), %v1230_v1  ;;  %s266_s8 = sand.u32 (!%p229_p10), 1, %s1314_s19   ;;  %vm994_vm4 = vcmask (!%p229_p10), 261120   ;;  %s1146_s12 = sshll.u32 (!%p229_p10), %s1322_s21, 8 }
  0x11   : > { %403 = vmatpush1.bf16.msra.mxu1 (!%p229_p10), %v1232_v2  ;;  %s1113_s9 = sshll.u32 (!%p229_p10), %s266_s8, 4  ;;  %s1507_s15 = scalar_lea.hbm (!%p229_p10), %s1560_s5, %s1146_s12 }
  0x12   : > { %s268_s10 = scalar_lea.vmem (!%p229_p10), [#allocation3], %s1113_s9  ;;  %s1509_s16 = scalar_lea.sflag (!%p229_p10), [#allocation4], %s266_s8 }
  0x16   : > { %s271_s11 = scalar_select %p270_p11, %s1322_s21, 1 }
  0x17   : > { %s1335_s21 = smov [#allocation3]  }
  0x18   : > { %s1144_s14 = sshll.u32 %s271_s11, 4  ;;  %s1012_s11 = sshll.u32 %s268_s10, 4  ;;  %s1502_s11 = int_to_ptr.vmem [resolvable:$true] %s1012_s11 }
  0x19   : > { %s277_s17 = scalar_lea.vmem %s1555_s0, %s1144_s14  ;;  %s287_s27 = scalar_lea.vmem %s1556_s1, %s1144_s14 }
  0x1a   : > { %v1228_v4 = vld [vmem:[%s277_s17] sm:$0xff]   ;;  %v1229_v5 = vld [vmem:[%s277_s17 + $0x8] sm:$0xff]   ;;  %s1252_s17 = scalar_lea.vmem %s1502_s11, 256  ;;  %s1256_s24 = sshll.u32 %s1335_s21, 4  ;;  %s1257_s24 = int_to_ptr.vmem [resolvable:$false] %s1256_s24 }
  0x1b   : > { %1155 = vmatprep.mubr.msk.bf16.mxu0 %vm316_vm0, %v1228_v4  ;;  %v1233_v6 = vld [vmem:[%s287_s27] sm:$0xff]   ;;  %v1234_v7 = vld [vmem:[%s287_s27 + $0x8] sm:$0xff]   ;;  %p1253_p12 = scmp.ne.s32.totalorder %s1502_s11, %s1252_s17  ;;  %s1258_s25 = scalar_lea.vmem %s1257_s24, 512 }
  0x1c   : > { %1156 = vmatmul.mubr.msk.bf16.vlgmr.msra.gmra.mrb[0].mxu0 %vm316_vm0, %v1229_v5  ;;  %1127 = vmatmul.mubr.msk.bf16.vlgmr.msra.gmra.mrb[0].mxu1 %vm316_vm0, %v1233_v6  ;;  %p1259_p1 = scmp.lt.s32.totalorder %s1502_s11, %s1257_s24  ;;  %p1260_p2 = scmp.lt.s32.totalorder %s1258_s25, %s1252_s17 }
  0x1d   : > { %517 = vmatprep.mubr.bf16.mxu0 %v1332_v3  ;;  %444 = vmatprep.mubr.bf16.mxu1 %v1332_v3  ;;  %p1254_p13 = pnand %p1253_p12, %p1408_p4 }
  0x1e   : > { %p1261_p3 = por %p1260_p2, %p1259_p1 }
  0x1f   : > { %p1255_p0 = pneg %p1254_p13 }
  0x21   : > { %p1262_p5 = pnand %p1261_p3, %p1255_p0 }
  0x24   : > { %1128 = vmatmul.mubr.msk.bf16.gmra.mrb[4].mxu1 %vm316_vm0, %v1234_v7 }
  0x25   : > { %636 = vmatprep.mubr.bf16.mxu1 %v1332_v3 }
  0xef   : > { %v1157_v8 = vpop.f32.mrb[0].mxu0  ;;  %v436_v11 = vpop.f32.mrb[0].mxu1 }
  0xf0   : > { %v357_v9 = vpop.f32.mrb[1].mxu0  ;;  %v695_v10 = vpack.c.bf16 %v1157_v8, %v1157_v8  ;;  %v1448_v14 = vpack.c.bf16 %v436_v11, %v436_v11  ;;  %v438_v15 = vpop.f32.mrb[1].mxu1 }
  0xf1   : > { %v1158_v12 = vpop.f32.mrb[2].mxu0  ;;  %v455_v13 = vpack.c.bf16 %v357_v9, %v357_v9  ;;  %v457_v17 = vpack.c.bf16 %v438_v15, %v438_v15  ;;  %v440_v18 = vpop.f32.mrb[2].mxu1 }
  0xf2   : > { %698 = vxpose.xlu1.c.b16.start.end [1/1] (short) (narrow) %v695_v10, 16  ;;  %v360_v16 = vpop.f32.mrb[3].mxu0  ;;  %v480_v19 = vsel %vm478_vm1, %v1448_v14, 0  ;;  %v1452_v20 = vpack.c.bf16 %v440_v18, %v440_v18  ;;  %v442_v21 = vpop.f32.mrb[3].mxu1  ;;  %v814_v22 = vpack.c.bf16 %v1158_v12, %v1158_v12 }
  0xf3   : > { %458 = vxpose.xlu0.c.b16.start.end [1/1] (short) (narrow) %v455_v13, 16  ;;  %v1454_v23 = vpack.c.bf16 %v442_v21, %v442_v21  ;;  %1129 = vmatprep.subr.msk.bf16.mxu0 %vm478_vm1, %v457_v17  ;;  %v576_v24 = vpack.c.bf16 %v360_v16, %v360_v16 }
  0xf4   : > { %v599_v25 = vsel %vm478_vm1, %v1452_v20, 0  ;;  %486 = vmatpush1.bf16.msra.mxu0 %v480_v19 }
  0xf5   : > { %1131 = vmatprep.subr.msk.bf16.mxu1 %vm478_vm1, %v1454_v23 }
  0xf6   : > { %817 = vxpose.xlu1.c.b16.start.end [1/1] (short) (narrow) %v814_v22, 16  ;;  %605 = vmatpush1.bf16.msra.mxu1 %v599_v25 }
  0xf7   : > { %579 = vxpose.xlu0.c.b16.start.end [1/1] (short) (narrow) %v576_v24, 16  ;;  %v446_v26 = vpop.f32.mrb[4].mxu1 }
  0xf8   : > { %v448_v27 = vpop.f32.mrb[5].mxu1  ;;  %v1465_v31 = vpack.c.bf16 %v446_v26, %v446_v26 }
  0xf9   : > { %v1461_v28 = vpack.c.bf16 %v448_v27, %v448_v27  ;;  %v450_v29 = vpop.f32.mrb[6].mxu1 }
  0xfa   : > { %v452_v30 = vpop.f32.mrb[7].mxu1  ;;  %v718_v33 = vsel %vm478_vm1, %v1465_v31, 0  ;;  %v1474_v36 = vpack.c.bf16 %v450_v29, %v450_v29 }
  0xfb   : > { %1133 = vmatprep.subr.msk.bf16.mxu1 %vm478_vm1, %v1461_v28  ;;  %v1470_v34 = vpack.c.bf16 %v452_v30, %v452_v30 }
  0xfc   : > { %v837_v38 = vsel %vm478_vm1, %v1474_v36, 0 }
 0x158   : > { %v706_v37 = vpop.trf.xlu1 }
 0x159   : > { %v466_v32 = vpop.trf.xlu0 }
 0x15a   : > { %1130 = vmatmul.mubr.msk.bf16.vlgmr.msra.gmra.mrb[4].mxu0 %vm474_vm2, %v466_v32 }
 0x15b   : > { %567 = vmatprep.mubr.bf16.mxu0 %v457_v17 }
 0x15c   : > { %v825_v39 = vpop.trf.xlu1 }
 0x15d   : > { %v587_v35 = vpop.trf.xlu0 }
 0x15e   : > { %1132 = vmatmul.mubr.msk.bf16.vlgmr.msra.gmra.mrb[8].mxu1 %vm474_vm2, %v587_v35 }
 0x15f   : > { %724 = vmatpush1.bf16.msra.mxu1 %v718_v33  ;;  %755 = vmatprep.mubr.bf16.mxu1 %v1332_v3 }
 0x160   : > { %1135 = vmatprep.subr.msk.bf16.mxu1 %vm478_vm1, %v1470_v34 }
 0x166   : > { %1134 = vmatmul.mubr.msk.bf16.vlgmr.msra.gmra.mrb[12].mxu1 %vm474_vm2, %v706_v37 }
 0x167   : > { %843 = vmatpush1.bf16.msra.mxu1 %v837_v38  ;;  %874 = vmatprep.mubr.bf16.mxu1 %v1332_v3 }
 0x16e   : > { %1136 = vmatmul.mubr.msk.bf16.vlgmr.msra.gmra.mrb[16].mxu1 %vm474_vm2, %v825_v39 }
 0x22d   : > { %v519_v40 = vpop.f32.mrb[4].mxu0 }
 0x22e   : > { %v521_v41 = vpop.f32.mrb[5].mxu0 }
 0x22f   : > { %v523_v42 = vpop.f32.mrb[6].mxu0 }
 0x230   : > { %v530_v43 = vadd.f32 %v523_v42, %v521_v41  ;;  %v525_v44 = vpop.f32.mrb[7].mxu0 }
 0x231   : > { %v528_v45 = vsub.f32 %v519_v40, %v525_v44  ;;  %v638_v46 = vpop.f32.mrb[8].mxu1 }
 0x232   : > { %1236 = vtanh.f32 %v530_v43  ;;  %v640_v47 = vpop.f32.mrb[9].mxu1 }
 0x233   : > { %1238 = vtanh.f32 %v528_v45  ;;  %v642_v48 = vpop.f32.mrb[10].mxu1  ;;  %v1235_v45 = vld [vmem:[%s1559_s4] sm:$0xff]  }
 0x234   : > { %v649_v49 = vadd.f32 %v642_v48, %v640_v47  ;;  %v644_v50 = vpop.f32.mrb[11].mxu1 }
 0x235   : > { %v647_v51 = vsub.f32 %v638_v46, %v644_v50 }
 0x236   : > { %1240 = vtanh.f32 %v649_v49 }
 0x237   : > { %1242 = vtanh.f32 %v647_v51 }
 0x239   : > { %v757_v52 = vpop.f32.mrb[12].mxu1 }
 0x23a   : > { %v759_v53 = vpop.f32.mrb[13].mxu1 }
 0x23b   : > { %v761_v54 = vpop.f32.mrb[14].mxu1 }
 0x23c   : > { %v1237_v55 = vpop.eup %1236  ;;  %v768_v56 = vadd.f32 %v761_v54, %v759_v53  ;;  %v763_v57 = vpop.f32.mrb[15].mxu1 }
 0x23d   : > { %v1239_v58 = vpop.eup %1238  ;;  %v766_v59 = vsub.f32 %v757_v52, %v763_v57  ;;  %v532_v60 = vsub.f32 0.0, %v1237_v55 }
 0x23e   : > { %1244 = vtanh.f32 %v768_v56  ;;  %v533_v61 = vpack.c.bf16 %v1237_v55, %v1239_v58 }
 0x23f   : > { %1246 = vtanh.f32 %v766_v59  ;;  %v534_v62 = vpack.c.bf16 %v1239_v58, %v532_v60 }
 0x240   : > { %v1241_v63 = vpop.eup %1240 }
 0x241   : > { %v1243_v0 = vpop.eup %1242  ;;  %535 = vmatprep.subr.bf16.mxu0 %v534_v62  ;;  %v876_v1 = vpop.f32.mrb[16].mxu1  ;;  %v651_v2 = vsub.f32 0.0, %v1241_v63 }
 0x242   : > { %536 = vmatpush1.bf16.xpose.msra.mxu0 %v533_v61  ;;  %v878_v3 = vpop.f32.mrb[17].mxu1  ;;  %v652_v4 = vpack.c.bf16 %v1241_v63, %v1243_v0 }
 0x243   : > { %v880_v5 = vpop.f32.mrb[18].mxu1  ;;  %v653_v6 = vpack.c.bf16 %v1243_v0, %v651_v2 }
 0x244   : > { %v887_v7 = vadd.f32 %v880_v5, %v878_v3  ;;  %v882_v8 = vpop.f32.mrb[19].mxu1 }
 0x245   : > { %654 = vmatprep.subr.bf16.mxu0 %v653_v6  ;;  %v885_v9 = vsub.f32 %v876_v1, %v882_v8 }
 0x246   : > { %1248 = vtanh.f32 %v887_v7 }
 0x247   : > { %1250 = vtanh.f32 %v885_v9 }
 0x248   : > { %v1245_v10 = vpop.eup %1244 }
 0x249   : > { %v1247_v11 = vpop.eup %1246  ;;  %568 = vmatmul.mubr.bf16.vlgmr.msra.gmra.mrb[8].mxu0 %v1448_v14  ;;  %v770_v12 = vsub.f32 0.0, %v1245_v10  ;;  %v1333_v14 = vmov 0.0  }
 0x24a   : > { %655 = vmatpush1.bf16.xpose.msra.mxu0 %v652_v4  ;;  %686 = vmatprep.mubr.bf16.mxu0 %v1454_v23  ;;  %v771_v13 = vpack.c.bf16 %v1245_v10, %v1247_v11 }
 0x24b   : > { %v772_v15 = vpack.c.bf16 %v1247_v11, %v770_v12  ;;  %1159 = vmatprep.subr.bf16.mxu1 %v1333_v14  ;;  %1163 = vmatprep.mubr.msk.bf16.mxu1 %vm1334_vm3, %v1333_v14 }
 0x24d   : > { %773 = vmatprep.subr.bf16.mxu0 %v772_v15 }
 0x250   : > { %v1249_v16 = vpop.eup %1248 }
 0x251   : > { %v1251_v17 = vpop.eup %1250  ;;  %687 = vmatmul.mubr.bf16.vlgmr.msra.gmra.mrb[12].mxu0 %v1452_v20  ;;  %v889_v18 = vsub.f32 0.0, %v1249_v16 }
 0x252   : > { %774 = vmatpush1.bf16.xpose.msra.mxu0 %v771_v13  ;;  %805 = vmatprep.mubr.bf16.mxu0 %v1461_v28  ;;  %v890_v19 = vpack.c.bf16 %v1249_v16, %v1251_v17 }
 0x253   : > { %v891_v21 = vpack.c.bf16 %v1251_v17, %v889_v18 }
 0x255   : > { %892 = vmatprep.subr.bf16.mxu0 %v891_v21 }
 0x259   : > { %806 = vmatmul.mubr.bf16.vlgmr.msra.gmra.mrb[16].mxu0 %v1465_v31 }
 0x25a   : > { %893 = vmatpush1.bf16.xpose.msra.mxu0 %v890_v19  ;;  %924 = vmatprep.mubr.bf16.mxu0 %v1470_v34 }
 0x261   : > { %925 = vmatmul.mubr.bf16.vlgmr.msra.gmra.mrb[20].mxu0 %v1474_v36 }
 0x31c   : > { %v569_v22 = vpop.f32.mrb[8].mxu0 }
 0x31d   : > { %575 = vst.msk [vmem:[#allocation2] sm:$0xff] %vm316_vm0, %v569_v22  ;;  %v571_v20 = vpop.f32.mrb[9].mxu0 }
 0x31e   : > { %v572_v23 = vpop.f32.mrb[10].mxu0 }
 0x31f   : > { %v573_v24 = vpop.f32.mrb[11].mxu0 }
 0x324   : > { %v688_v25 = vpop.f32.mrb[12].mxu0  ;;  %v933_v30 = vld [vmem:[#allocation2] sm:$0xff] }
 0x325   : > { %694 = vst.msk [vmem:[#allocation2 + $0x8] sm:$0xff] %vm316_vm0, %v688_v25  ;;  %v690_v26 = vpop.f32.mrb[13].mxu0 }
 0x326   : > { %v691_v27 = vpop.f32.mrb[14].mxu0 }
 0x327   : > { %v692_v28 = vpop.f32.mrb[15].mxu0 }
 0x32c   : > { %v807_v29 = vpop.f32.mrb[16].mxu0  ;;  %v934_v31 = vld [vmem:[#allocation2 + $0x8] sm:$0xff] }
 0x32d   : > { %813 = vst.msk [vmem:[#allocation2 + $0x10] sm:$0xff] %vm316_vm0, %v807_v29  ;;  %v809_v32 = vpop.f32.mrb[17].mxu0  ;;  %v937_v33 = vpack.c.bf16 %v934_v31, %v933_v30 }
 0x32e   : > { %v810_v34 = vpop.f32.mrb[18].mxu0 }
 0x32f   : > { %v811_v35 = vpop.f32.mrb[19].mxu0  ;;  %v948_v36 = vsel %vm316_vm0, %v937_v33, 0 }
 0x330   : > { %1160 = vmatpush3.bf16.xpose.msra.mxu1 %v948_v36 }
 0x331   : > { %1161 = vmatprep.subr.bf16.mxu1 %v1333_v14 }
 0x334   : > { %v926_v37 = vpop.f32.mrb[20].mxu0  ;;  %v935_v41 = vld [vmem:[#allocation2 + $0x10] sm:$0xff] }
 0x335   : > { %932 = vst.msk [vmem:[#allocation2 + $0x18] sm:$0xff] %vm316_vm0, %v926_v37  ;;  %v928_v38 = vpop.f32.mrb[21].mxu0 }
 0x336   : > { %v929_v39 = vpop.f32.mrb[22].mxu0 }
 0x337   : > { %v930_v40 = vpop.f32.mrb[23].mxu0 }
 0x33c   : > { %v936_v42 = vld [vmem:[#allocation2 + $0x18] sm:$0xff] }
 0x33d   : > { %v938_v43 = vpack.c.bf16 %v936_v42, %v935_v41 }
 0x33f   : > { %v951_v44 = vsel %vm316_vm0, %v938_v43, 0 }
 0x340   : > { %1162 = vmatpush3.bf16.xpose.msra.mxu1 %v951_v44 }
 0x347   : > { %1164 = vmatmul.mubr.msk.bf16.vlgmr.msra.gmra.mrb[20].mxu1 %vm316_vm0, %v1235_v45 }
 0x41a   : > { %v987_v46 = vpop.f32.mrb[20].mxu1 }
 0x41b   : > { %995 = vst.msk [vmem:[%s268_s10] sm:$0xff] %vm994_vm4, %v987_v46  ;;  %v1165_v47 = vpop.f32.mrb[21].mxu1 }
 0x41c   : > { %v990_v48 = vpop.f32.mrb[22].mxu1 }
 0x41d   : > { %996 = vst.msk [vmem:[%s268_s10 + $0x8] sm:$0xff] %vm994_vm4, %v990_v48  ;;  %v1166_v49 = vpop.f32.mrb[23].mxu1 }
 0x41e   : > { %1265 = shalt.err (!%p1262_p5)
}
 0x41f   : > { %s1266_s27 = scalar_lea.hbm %s1507_s15, 256  ;;  %s1270_s8 = scalar_lea.hbm %s1560_s5, 512 }
 0x420   : > { %p1267_p6 = scmp.ne.s32.totalorder %s1507_s15, %s1266_s27  ;;  %p1271_p10 = scmp.lt.u32.totalorder %s1507_s15, %s1560_s5 }
 0x421   : > { %p1272_p11 = scmp.lt.u32.totalorder %s1270_s8, %s1266_s27  ;;  %p1274_p13 = scmp.lt.u32.totalorder %s1266_s27, %s1507_s15 }
 0x422   : > { %p1268_p7 = pnand %p1267_p6, %p1408_p4 }
 0x423   : > { %p1273_p12 = por %p1272_p11, %p1271_p10 }
 0x424   : > { %p1269_p9 = pneg %p1268_p7 }
 0x425   : > { %p1275_p0 = por %p1274_p13, %p1273_p12 }
 0x427   : > { %p1276_p1 = pnand %p1275_p0, %p1269_p9 }
 0x429   : > { %1279 = shalt.err (!%p1276_p1)
}
 0x42a   : > { %s1336_s12 = smov 128   ;;  %s1337_s13 = smov 8  }
 0x42b   : > { %1167 = dma.vmem_to_hbm [thread:$0]  (%p1408_p4), %s1502_s11, 256, %s1507_s15, %s1509_s16, %s1336_s12, %s1336_s12, %s1337_s13  }
 0x42c PF: > { %p1173_p2 = scmp.ge.s32.totalorder %s1330_s23, 2  ;;  %s1027_s14 = sand.u32 1, %s1310_s18  }
 0x42d   : > { %s1028_s17 = scalar_lea.sflag [#allocation4], %s1027_s14 }
 0x42e   : > { %p1170_p3 = pnand %p1173_p2, %p1415_p8 }
 0x430   : > { %1305 = dma.done.wait (!%p1170_p3), %s1028_s17, 256  }
 0x431   : > { %1307 = vsyncadd (!%p1170_p3), %s1028_s17, 4294967040  ;;  %s18_s23 = sadd.s32 1, %s1330_s23   ;;  %s1563_s18 = smov %s1314_s19 }
 0x432   : > { %p15_p5 = scmp.ge.s32.totalorder %s18_s23, 4   ;;  %s1564_s19 = smov %s1318_s20 }
 0x433   : > { %s1565_s20 = smov %s1421_s6  ;;  %s1566_s21 = smov %s1326_s22 }
 0x434   : > { %s1567_s22 = smov %s1569_s26  ;;  %17 = sbr.rel (!%p15_p5) target bundleno = 4 (0x4), region = 78 }
 0x43b   :  { %1033 = vsyncpa [#allocation4], 1 }
 0x43c   :  { %1035 = vsyncpa [#allocation4 + $0x1], 1 }

</bundles_post_ra>
